<compile_context>
chip_gen: v7x
topology: tpu7x:2x2x1
jax: 0.10.0
libtpu: 0.0.40
codegen_flags: <defaults>
</compile_context>

<pallas_src>
import jax
import jax.numpy as jnp
from jax.experimental import pallas as pl
from jax.experimental.pallas import tpu as pltpu

_LANE = 128


def _make_rescale_kernel(a, b):
    """y = x * a + b   (two VPU ops per vreg). a, b are Python floats
    (weakly typed) so bf16/fp16 inputs stay in their storage dtype."""

    def kernel(x_ref, o_ref):
        o_ref[...] = x_ref[...] * a + b

    return kernel


def _vmem_limit_bytes():
    """3/4 of physical VMEM, capped at 64 MiB.
    v5e/v6e (128 MiB physical) -> 64 MiB; v7x (64 MiB per TC) -> 48 MiB."""
    try:
        cap = int(pltpu.get_tpu_info().vmem_capacity_bytes)
    except Exception:
        cap = 64 << 20  # conservative fallback (v7x per-TC size)
    return min((cap * 3) // 4, 64 << 20)


def rescale(x, low, high, block_rows=None):
    """Apply Rescale elementwise via a Pallas TPU kernel.

    x: any-shaped float array (e.g. NCHW). Returns same shape/dtype.
    """
    assert high > low
    orig_shape = x.shape
    dtype = x.dtype
    itemsize = jnp.dtype(dtype).itemsize
    total = x.size

    # Affine fold (Python floats stay weakly typed -> no dtype promotion).
    a = 0.5 * (float(high) - float(low))
    b = a + float(low)

    x_flat = jnp.ravel(x)  # free for a contiguous array

    rows = total // _LANE
    tail = total - rows * _LANE

    # Tiny-array / tail-only case: nothing lane-divisible to run on the TPU
    # vector path -- one fused XLA multiply-add handles it.
    if rows == 0:
        return (x_flat * a + b).reshape(orig_shape)

    x_main = x_flat[: rows * _LANE].reshape(rows, _LANE)

    # dtype-aware sublane alignment: 8 rows for f32, 16 for bf16/f16,
    # 32 for int8/fp8.
    sub = 8 * max(1, 4 // itemsize)

    vmem_limit = _vmem_limit_bytes()
    if block_rows is None:
        # in + out, each double-buffered = 4 live blocks; keep their sum at
        # <= half the scoped VMEM limit  =>  block_bytes <= vmem_limit / 8.
        block_bytes = vmem_limit // 8
        block_rows = max(sub, block_bytes // (_LANE * itemsize))

    if rows <= block_rows:
        tr = rows  # full extent: always a legal block shape
    else:
        tr = max(sub, (block_rows // sub) * sub)

    grid = (pl.cdiv(rows, tr),)  # Pallas masks the partial last block.

    out_main = pl.pallas_call(
        _make_rescale_kernel(a, b),
        out_shape=jax.ShapeDtypeStruct((rows, _LANE), dtype),
        grid_spec=pltpu.PrefetchScalarGridSpec(
            num_scalar_prefetch=0,
            grid=grid,
            in_specs=[pl.BlockSpec((tr, _LANE), lambda i: (i, 0))],
            out_specs=pl.BlockSpec((tr, _LANE), lambda i: (i, 0)),
        ),
        compiler_params=pltpu.CompilerParams(
            dimension_semantics=("parallel",),
            vmem_limit_bytes=int(vmem_limit),
        ),
        cost_estimate=pl.CostEstimate(
            flops=2 * rows * _LANE,
            bytes_accessed=2 * rows * _LANE * itemsize,
            transcendentals=0,
        ),
    )(x_main)

    if tail:
        # Ragged tail (< 128 elements): one-line XLA expression, no
        # whole-array pad/slice round trips.
        tail_out = x_flat[rows * _LANE:] * a + b
        return jnp.concatenate([out_main.reshape(-1), tail_out]).reshape(orig_shape)
    return out_main.reshape(orig_shape)


def _reference(x, low, high):
    return ((x + 1.0) / 2.0) * (high - low) + low


if __name__ == "__main__":
    key = jax.random.PRNGKey(0)
    low, high = 0.0, 255.0

    # Main case: NCHW activation in [-1, 1], lane-divisible (fast path).
    x = jax.random.uniform(key, (2, 4, 16, 16), dtype=jnp.float32,
                           minval=-1.0, maxval=1.0)
    out = jax.block_until_ready(rescale(x, low, high))
    ref = _reference(x, low, high)
    assert out.shape == x.shape and out.dtype == x.dtype
    assert jnp.allclose(out, ref, atol=1e-4, rtol=1e-5)

    k1, k2, k3 = jax.random.split(key, 3)

    # Partial last block (rows=20, tr=8 -> grid of 3 with a masked tail).
    x2 = jax.random.uniform(k1, (2, 5, 16, 16), dtype=jnp.float32,
                            minval=-1.0, maxval=1.0)
    out2 = jax.block_until_ready(rescale(x2, low, high, block_rows=8))
    assert jnp.allclose(out2, _reference(x2, low, high), atol=1e-4, rtol=1e-5)

    # Non-lane-divisible: 165 elems = 1 full row + 37-elem jnp tail.
    x3 = jax.random.uniform(k2, (3, 5, 11), dtype=jnp.float32,
                            minval=-1.0, maxval=1.0)
    out3 = jax.block_until_ready(rescale(x3, -1.0, 1.0))
    assert out3.shape == x3.shape
    assert jnp.allclose(out3, _reference(x3, -1.0, 1.0), atol=1e-5, rtol=1e-5)

    # Tiny array (< 128 elems): pure XLA tail path.
    x4 = jax.random.uniform(k3, (3, 5, 7), dtype=jnp.float32,
                            minval=-1.0, maxval=1.0)
    out4 = jax.block_until_ready(rescale(x4, 0.0, 1.0))
    assert jnp.allclose(out4, _reference(x4, 0.0, 1.0), atol=1e-5, rtol=1e-5)

    # bf16 path exercises the dtype-aware sublane rounding (sub=16).
    x5 = jax.random.uniform(k3, (2, 4, 16, 16), dtype=jnp.bfloat16,
                            minval=-1.0, maxval=1.0)
    out5 = jax.block_until_ready(rescale(x5, low, high, block_rows=16))
    assert out5.dtype == jnp.bfloat16
    assert jnp.allclose(out5.astype(jnp.float32),
                        _reference(x5.astype(jnp.float32), low, high),
                        atol=1.0, rtol=1e-2)

    print("KERNEL_OK")
</pallas_src>

<mosaic_0001>
module attributes {stable_mosaic.version = 11 : i64} {
  func.func @kernel(%arg0: i32, %arg1: memref<16x128xf32, #tpu.memory_space<vmem>>, %arg2: memref<16x128xf32, #tpu.memory_space<vmem>>) attributes {dimension_semantics = [#tpu.dimension_semantics<parallel>], iteration_bounds = array<i64: 1>, scalar_prefetch = 0 : i64, scratch_operands = 0 : i64, tpu.core_type = #tpu.core_type<tc>, window_params = [{transform_indices = @transform_0, window_bounds = array<i64: 16, 128>}, {transform_indices = @transform_1, window_bounds = array<i64: 16, 128>}]} {
    %c0 = arith.constant 0 : index
    %c0_0 = arith.constant 0 : index
    %0 = vector.load %arg1[%c0, %c0_0] : memref<16x128xf32, #tpu.memory_space<vmem>>, vector<16x128xf32>
    %cst = arith.constant 1.275000e+02 : f32
    %1 = vector.broadcast %cst : f32 to vector<16x128xf32>
    %2 = arith.mulf %0, %1 : vector<16x128xf32>
    %cst_1 = arith.constant 1.275000e+02 : f32
    %3 = vector.broadcast %cst_1 : f32 to vector<16x128xf32>
    %4 = arith.addf %2, %3 : vector<16x128xf32>
    %c0_2 = arith.constant 0 : index
    %c0_3 = arith.constant 0 : index
    %5 = vector.load %arg2[%c0_2, %c0_3] : memref<16x128xf32, #tpu.memory_space<vmem>>, vector<16x128xf32>
    tpu.vector_store %arg2[%c0_2, %c0_3], %4 {strides = array<i32>} : memref<16x128xf32, #tpu.memory_space<vmem>>, vector<16x128xf32>,
    return
  }
  func.func @transform_0(%arg0: i32) -> (i32, i32) {
    %c0_i32 = arith.constant 0 : i32
    %c0_i32_0 = arith.constant 0 : i32
    return %arg0, %c0_i32 : i32, i32
  }
  func.func @transform_1(%arg0: i32) -> (i32, i32) {
    %c0_i32 = arith.constant 0 : i32
    %c0_i32_0 = arith.constant 0 : i32
    return %arg0, %c0_i32 : i32, i32
  }
}

</mosaic_0001>

<bundles_post_ra>
// kernel: tpu_custom_call.1
= control target key start
LH: loop header
LB: loop body
LE: loop exit
PB: predicated region body
PF: predicated region fallthrough
CT: control target
= control target key end

     0   :  { %6 = vsyncpa [#allocation3], 0  ;;  %s144_s0 = inlined_call_operand.hbm [shape: f32[16,128], index: 0, kind: input, shape index: {}]   ;;  %s145_s1 = inlined_call_operand.hbm [shape: f32[16,128], index: 1, kind: output, shape index: {}]  }
   0x1   :  { %7 = vsyncpa [#allocation4], 0  ;;  %s100_s6 = smov [#allocation2]   ;;  %s52_s10 = scalar_lea.hbm %s144_s0, 256 }
   0x2   :  { %s13_s7 = sshll.u32 %s100_s6, 4  ;;  %p53_p0 = scmp.ne.s32.totalorder %s144_s0, %s52_s10  ;;  %s14_s7 = int_to_ptr.vmem [resolvable:$true] %s13_s7 }
   0x3   :  { %p56_p1 = scmp.lt.u32.totalorder %s52_s10, %s144_s0 }
   0x5   :  { %p58_p2 = pnand %p56_p1, %p53_p0 }
   0x7   :  { %61 = shalt.err (!%p58_p2)
}
   0x8   :  { %s62_s15 = scalar_lea.vmem %s14_s7, 256  ;;  %p67_p4 = scmp.lt.s32.totalorder %s14_s7, %s14_s7 }
   0x9   :  { %p63_p3 = scmp.ne.s32.totalorder %s14_s7, %s62_s15  ;;  %p68_p5 = scmp.lt.s32.totalorder %s62_s15, %s62_s15 }
   0xb   :  { %p69_p6 = por %p68_p5, %p67_p4 }
   0xd   :  { %p70_p7 = pnand %p69_p6, %p63_p3 }
   0xf   :  { %73 = shalt.err (!%p70_p7)
}
  0x10   :  { %s101_s16 = smov 128   ;;  %s102_s17 = smov 8  }
  0x11   :  { %19 = dma.hbm_to_vmem [thread:$0]  %s144_s0, 256, %s14_s7, [#allocation3], %s101_s16, %s101_s16, %s102_s17  }
  0x12   :  { %96 = dma.done.wait [#allocation3], 256  }
  0x13   :  { %97 = vsyncadd [#allocation3], 4294967040  ;;  %v23_v0 = vld [vmem:[#allocation2] sm:$0xff]  ;;  %v24_v1 = vld [vmem:[#allocation2 + $0x8] sm:$0xff]  ;;  %s103_s20 = smov [#allocation5]  }
  0x14   :  { %s36_s21 = sshll.u32 %s103_s20, 4  ;;  %v25_v2 = vmul.f32 127.5, %v23_v0  ;;  %v26_v3 = vmul.f32 127.5, %v24_v1  ;;  %s37_s21 = int_to_ptr.vmem [resolvable:$true] %s36_s21 }
  0x15   :  { %s74_s22 = scalar_lea.vmem %s37_s21, 256  ;;  %p79_p9 = scmp.lt.s32.totalorder %s37_s21, %s37_s21 }
  0x16   :  { %v27_v4 = vadd.f32 127.5, %v25_v2  ;;  %v28_v5 = vadd.f32 127.5, %v26_v3  ;;  %p75_p8 = scmp.ne.s32.totalorder %s37_s21, %s74_s22  ;;  %p80_p10 = scmp.lt.s32.totalorder %s74_s22, %s74_s22 }
  0x18   :  { %29 = vst [vmem:[#allocation5] sm:$0xff] %v27_v4  ;;  %30 = vst [vmem:[#allocation5 + $0x8] sm:$0xff] %v28_v5  ;;  %p81_p11 = por %p80_p10, %p79_p9 }
  0x1a   :  { %p82_p12 = pnand %p81_p11, %p75_p8 }
  0x1c   :  { %85 = shalt.err (!%p82_p12)
}
  0x1d   :  { %s86_s24 = scalar_lea.hbm %s145_s1, 256 }
  0x1e   :  { %p87_p13 = scmp.ne.s32.totalorder %s145_s1, %s86_s24  ;;  %p90_p0 = scmp.lt.u32.totalorder %s86_s24, %s145_s1 }
  0x20   :  { %p92_p1 = pnand %p90_p0, %p87_p13 }
  0x22   :  { %95 = shalt.err (!%p92_p1)
}
  0x23   :  { %42 = dma.vmem_to_hbm [thread:$0]  %s37_s21, 256, %s145_s1, [#allocation4], %s101_s16, %s101_s16, %s102_s17  }
  0x24   :  { %98 = dma.done.wait [#allocation4], 256  }
  0x25   :  { %99 = vsyncadd [#allocation4], 4294967040 }
  0x26   :  { %46 = vsyncpa [#allocation3], 1 }
  0x27   :  { %47 = vsyncpa [#allocation4], 1 }

</bundles_post_ra>
